<compile_context>
chip_gen: v7x
topology: tpu7x:2x2x1
jax: 0.10.0
libtpu: 0.0.40
codegen_flags: <defaults>
</compile_context>

<pallas_src>
import jax
import jax.numpy as jnp
from jax.experimental import pallas as pl
from jax.experimental.pallas import tpu as pltpu


def _lau_kernel(q_ref, ubT_ref,
                wqT_ref, wubT_ref, wprodT_ref, b0T_ref,
                w1T_ref, b1T_ref, w2T_ref, b2_ref,
                out_ref):
    """One (batch b, col-tile t) step, computed in transposed (feat, T) layout."""
    q = q_ref[...]                                        # (1, E) query row

    # Per-batch folded layer-0 parameters (tiny: (H0, E) and (H0, 1)).
    wcombT = wubT_ref[...] + q * wprodT_ref[...]          # (H0, E)
    bias0 = b0T_ref[...] + jnp.sum(wqT_ref[...] * q, axis=1, keepdims=True)  # (H0, 1)

    # Layer 0: single (H0, E) @ (E, TN) matmul + sigmoid.  Everything lane-dense.
    h = jax.nn.sigmoid(
        jnp.dot(wcombT, ubT_ref[...], preferred_element_type=jnp.float32) + bias0)

    # Layer 1: (H1, H0) @ (H0, TN) + sigmoid.
    h = jax.nn.sigmoid(
        jnp.dot(w1T_ref[...], h, preferred_element_type=jnp.float32) + b1T_ref[...])

    # Final dense: (1, H1) @ (H1, TN) -> lane-dense (1, TN) store.
    out = jnp.dot(w2T_ref[...], h, preferred_element_type=jnp.float32) + b2_ref[...]
    out_ref[...] = out.astype(out_ref.dtype)              # (1, TN)


def _pick_col_tile(T, target):
    """Largest multiple-of-128 divisor of T that is <= target; else full T."""
    if T <= target:
        return T
    t = (min(target, T) // 128) * 128
    while t >= 128:
        if T % t == 0:
            return t
        t -= 128
    # TODO(synk): ragged T with no 128-multiple divisor; fall back to one full-T tile.
    return T


def local_activation_unit(query, user_behavior, params, *,
                          block_cols=1024,
                          vmem_limit_bytes=32 * 1024 * 1024):
    """query: (B, 1, E); user_behavior: (B, T, E)  ->  (B, T, 1)."""
    B, one, E = query.shape
    assert one == 1
    Bu, T, E2 = user_behavior.shape
    assert Bu == B and E2 == E

    w0, b0, w1, b1, w2, b2 = params
    assert w0.shape[0] == 4 * E
    H0 = w0.shape[1]
    H1 = w1.shape[1]

    # Fold the 4-way concat; pre-transpose everything to (out_feat, in_feat) /
    # (out_feat, 1) so the kernel runs with features on sublanes, T on lanes.
    wqT = (w0[:E] + w0[2 * E:3 * E]).T          # (H0, E)   multiplies the query
    wubT = (w0[E:2 * E] - w0[2 * E:3 * E]).T    # (H0, E)   multiplies user behavior
    wprodT = w0[3 * E:].T                       # (H0, E)   multiplies q * ub
    b0T = b0.reshape(1, H0).T                   # (H0, 1)
    w1T = w1.T                                  # (H1, H0)
    b1T = b1.reshape(1, H1).T                   # (H1, 1)
    w2T = w2.T                                  # (1, H1)
    b2r = b2.reshape(1, 1)                      # (1, 1)

    # Layout plumbing: behaviors as (B, E, T) so the kernel's last dim is T
    # (lane-dense loads, dense vregs, large contiguous DMA rows).
    ubT = jnp.swapaxes(user_behavior, 1, 2)     # (B, E, T)

    tn = _pick_col_tile(T, block_cols)
    grid = (B, T // tn)

    def resident(shape):
        # Constant block index -> fetched once, stays VMEM-resident across grid.
        return pl.BlockSpec(shape, lambda b, t: (0, 0))

    out = pl.pallas_call(
        _lau_kernel,
        out_shape=jax.ShapeDtypeStruct((B, 1, T), jnp.float32),
        grid_spec=pltpu.PrefetchScalarGridSpec(
            num_scalar_prefetch=0,
            grid=grid,
            in_specs=[
                # query: one (1, E) row per batch (re-DMA'd only when b changes).
                pl.BlockSpec((None, 1, E), lambda b, t: (b, 0, 0)),
                # user behaviors, transposed: (E, TN) column tile of batch b.
                pl.BlockSpec((None, E, tn), lambda b, t: (b, 0, t)),
                # weights / biases (~20 KB total): VMEM-resident.
                resident(wqT.shape), resident(wubT.shape), resident(wprodT.shape),
                resident(b0T.shape), resident(w1T.shape), resident(b1T.shape),
                resident(w2T.shape), resident(b2r.shape),
            ],
            # Lane-dense output: (1, TN) block of the (B, 1, T) slab.
            out_specs=pl.BlockSpec((None, 1, tn), lambda b, t: (b, 0, t)),
        ),
        compiler_params=pltpu.CompilerParams(
            dimension_semantics=("parallel", "parallel"),
            vmem_limit_bytes=vmem_limit_bytes,
        ),
    )(query, ubT, wqT, wubT, wprodT, b0T, w1T, b1T, w2T, b2r)

    # (B, 1, T) -> (B, T, 1): identical flat layout, free reshape.
    return out.reshape(B, T, 1)


def make_params(key, embedding_dim=4, hidden_units=(64, 32), init_std=1e-4):
    """Synthetic parameters matching the PyTorch module's shapes.

    DNN linears: Linear(4E -> H0), Linear(H0 -> H1) with N(0, init_std) weights
    (as in DNN.__init__); dense: Linear(H1 -> 1). Weights stored (in, out);
    biases as (1, out).
    """
    in_dim = 4 * embedding_dim
    h0, h1 = hidden_units
    k = jax.random.split(key, 6)
    w0 = init_std * jax.random.normal(k[0], (in_dim, h0), jnp.float32)
    b0 = 0.01 * jax.random.normal(k[1], (1, h0), jnp.float32)
    w1 = init_std * jax.random.normal(k[2], (h0, h1), jnp.float32)
    b1 = 0.01 * jax.random.normal(k[3], (1, h1), jnp.float32)
    w2 = (1.0 / jnp.sqrt(h1)) * jax.random.normal(k[4], (h1, 1), jnp.float32)
    b2 = 0.01 * jax.random.normal(k[5], (1, 1), jnp.float32)
    return (w0, b0, w1, b1, w2, b2)


def _reference(query, user_behavior, params):
    """Pure-JAX reference of the PyTorch forward, for correctness check."""
    w0, b0, w1, b1, w2, b2 = params
    B, _, E = query.shape
    T = user_behavior.shape[1]
    q = jnp.broadcast_to(query, (B, T, E))
    x = jnp.concatenate([q, user_behavior, q - user_behavior, q * user_behavior], axis=-1)
    h = jax.nn.sigmoid(x @ w0 + b0)
    h = jax.nn.sigmoid(h @ w1 + b1)
    return h @ w2 + b2


if __name__ == "__main__":
    B, T, E = 2, 8, 4
    key = jax.random.PRNGKey(0)
    kq, kub, kp = jax.random.split(key, 3)

    query = jax.random.normal(kq, (B, 1, E), jnp.float32)
    user_behavior = jax.random.normal(kub, (B, T, E), jnp.float32)
    params = make_params(kp, embedding_dim=E, hidden_units=(64, 32))

    lau = jax.jit(local_activation_unit,
                  static_argnames=("block_cols", "vmem_limit_bytes"))

    # Primary run at the module's example shapes (single tile per batch).
    out = jax.block_until_ready(lau(query, user_behavior, params))
    ref = _reference(query, user_behavior, params)
    assert out.shape == (B, T, 1)
    assert jnp.allclose(out, ref, atol=1e-5, rtol=1e-5)

    # Secondary check exercising the multi-tile grid path with 128-lane tiles.
    T2 = 256
    ub2 = jax.random.normal(jax.random.PRNGKey(1), (B, T2, E), jnp.float32)
    out2 = jax.block_until_ready(lau(query, ub2, params, block_cols=128))
    ref2 = _reference(query, ub2, params)
    assert out2.shape == (B, T2, 1)
    assert jnp.allclose(out2, ref2, atol=1e-5, rtol=1e-5)

    print("KERNEL_OK")
</pallas_src>

<mosaic_0001>
module attributes {stable_mosaic.version = 11 : i64} {
  func.func @_lau_kernel(%arg0: i32, %arg1: i32, %arg2: memref<1x1x4xf32, #tpu.memory_space<vmem>>, %arg3: memref<1x4x8xf32, #tpu.memory_space<vmem>>, %arg4: memref<64x4xf32, #tpu.memory_space<vmem>>, %arg5: memref<64x4xf32, #tpu.memory_space<vmem>>, %arg6: memref<64x4xf32, #tpu.memory_space<vmem>>, %arg7: memref<64x1xf32, #tpu.memory_space<vmem>>, %arg8: memref<32x64xf32, #tpu.memory_space<vmem>>, %arg9: memref<32x1xf32, #tpu.memory_space<vmem>>, %arg10: memref<1x32xf32, #tpu.memory_space<vmem>>, %arg11: memref<1x1xf32, #tpu.memory_space<vmem>>, %arg12: memref<1x1x8xf32, #tpu.memory_space<vmem>>) attributes {dimension_semantics = [#tpu.dimension_semantics<parallel>, #tpu.dimension_semantics<parallel>], iteration_bounds = array<i64: 2, 1>, scalar_prefetch = 0 : i64, scratch_operands = 0 : i64, tpu.core_type = #tpu.core_type<tc>, window_params = [{transform_indices = @transform_0, window_bounds = array<i64: 1, 1, 4>}, {transform_indices = @transform_1, window_bounds = array<i64: 1, 4, 8>}, {pipeline_mode = #tpu.pipeline_mode<synchronous>, transform_indices = @transform_2, window_bounds = array<i64: 64, 4>}, {pipeline_mode = #tpu.pipeline_mode<synchronous>, transform_indices = @transform_3, window_bounds = array<i64: 64, 4>}, {pipeline_mode = #tpu.pipeline_mode<synchronous>, transform_indices = @transform_4, window_bounds = array<i64: 64, 4>}, {pipeline_mode = #tpu.pipeline_mode<synchronous>, transform_indices = @transform_5, window_bounds = array<i64: 64, 1>}, {pipeline_mode = #tpu.pipeline_mode<synchronous>, transform_indices = @transform_6, window_bounds = array<i64: 32, 64>}, {pipeline_mode = #tpu.pipeline_mode<synchronous>, transform_indices = @transform_7, window_bounds = array<i64: 32, 1>}, {pipeline_mode = #tpu.pipeline_mode<synchronous>, transform_indices = @transform_8, window_bounds = array<i64: 1, 32>}, {pipeline_mode = #tpu.pipeline_mode<synchronous>, transform_indices = @transform_9, window_bounds = array<i64: 1, 1>}, {transform_indices = @transform_10, window_bounds = array<i64: 1, 1, 8>}]} {
    %c0 = arith.constant 0 : index
    %c0_0 = arith.constant 0 : index
    %c0_1 = arith.constant 0 : index
    %0 = vector.load %arg2[%c0, %c0_0, %c0_1] : memref<1x1x4xf32, #tpu.memory_space<vmem>>, vector<1x1x4xf32>
    %1 = vector.shape_cast %0 : vector<1x1x4xf32> to vector<1x4xf32>
    %c0_2 = arith.constant 0 : index
    %c0_3 = arith.constant 0 : index
    %2 = vector.load %arg5[%c0_2, %c0_3] : memref<64x4xf32, #tpu.memory_space<vmem>>, vector<64x4xf32>
    %c0_4 = arith.constant 0 : index
    %c0_5 = arith.constant 0 : index
    %3 = vector.load %arg6[%c0_4, %c0_5] : memref<64x4xf32, #tpu.memory_space<vmem>>, vector<64x4xf32>
    %4 = vector.broadcast %1 : vector<1x4xf32> to vector<64x4xf32>
    %5 = arith.mulf %4, %3 : vector<64x4xf32>
    %6 = arith.addf %2, %5 : vector<64x4xf32>
    %c0_6 = arith.constant 0 : index
    %c0_7 = arith.constant 0 : index
    %7 = vector.load %arg7[%c0_6, %c0_7] : memref<64x1xf32, #tpu.memory_space<vmem>>, vector<64x1xf32>
    %c0_8 = arith.constant 0 : index
    %c0_9 = arith.constant 0 : index
    %8 = vector.load %arg4[%c0_8, %c0_9] : memref<64x4xf32, #tpu.memory_space<vmem>>, vector<64x4xf32>
    %9 = vector.broadcast %1 : vector<1x4xf32> to vector<64x4xf32>
    %10 = arith.mulf %8, %9 : vector<64x4xf32>
    %cst = arith.constant dense<0.000000e+00> : vector<64xf32>
    %11 = vector.multi_reduction <add>, %10, %cst [1] : vector<64x4xf32> to vector<64xf32>
    %12 = vector.shape_cast %11 : vector<64xf32> to vector<64x1xf32>
    %13 = arith.addf %7, %12 : vector<64x1xf32>
    %c0_10 = arith.constant 0 : index
    %c0_11 = arith.constant 0 : index
    %c0_12 = arith.constant 0 : index
    %14 = vector.load %arg3[%c0_10, %c0_11, %c0_12] : memref<1x4x8xf32, #tpu.memory_space<vmem>>, vector<1x4x8xf32>
    %15 = vector.shape_cast %14 : vector<1x4x8xf32> to vector<4x8xf32>
    %cst_13 = arith.constant dense<0.000000e+00> : vector<64x8xf32>
    %16 = tpu.matmul %6, %15, %cst_13 {dimension_numbers = #tpu.dot_dimension_numbers<[1], [0], [0], [1], [0, 0, 1, 1], [], []>} : vector<64x4xf32>, vector<4x8xf32>, vector<64x8xf32> -> vector<64x8xf32>
    %17 = vector.broadcast %13 : vector<64x1xf32> to vector<64x8xf32>
    %18 = arith.addf %16, %17 : vector<64x8xf32>
    %19 = arith.negf %18 : vector<64x8xf32>
    %20 = math.exp %19 : vector<64x8xf32>
    %cst_14 = arith.constant 1.000000e+00 : f32
    %21 = vector.broadcast %cst_14 : f32 to vector<64x8xf32>
    %22 = arith.addf %21, %20 : vector<64x8xf32>
    %23 = arith.divf %21, %22 : vector<64x8xf32>
    %c0_15 = arith.constant 0 : index
    %c0_16 = arith.constant 0 : index
    %24 = vector.load %arg8[%c0_15, %c0_16] : memref<32x64xf32, #tpu.memory_space<vmem>>, vector<32x64xf32>
    %cst_17 = arith.constant dense<0.000000e+00> : vector<32x8xf32>
    %25 = tpu.matmul %24, %23, %cst_17 {dimension_numbers = #tpu.dot_dimension_numbers<[1], [0], [0], [1], [0, 0, 1, 1], [], []>} : vector<32x64xf32>, vector<64x8xf32>, vector<32x8xf32> -> vector<32x8xf32>
    %c0_18 = arith.constant 0 : index
    %c0_19 = arith.constant 0 : index
    %26 = vector.load %arg9[%c0_18, %c0_19] : memref<32x1xf32, #tpu.memory_space<vmem>>, vector<32x1xf32>
    %27 = vector.broadcast %26 : vector<32x1xf32> to vector<32x8xf32>
    %28 = arith.addf %25, %27 : vector<32x8xf32>
    %29 = arith.negf %28 : vector<32x8xf32>
    %30 = math.exp %29 : vector<32x8xf32>
    %cst_20 = arith.constant 1.000000e+00 : f32
    %31 = vector.broadcast %cst_20 : f32 to vector<32x8xf32>
    %32 = arith.addf %31, %30 : vector<32x8xf32>
    %33 = arith.divf %31, %32 : vector<32x8xf32>
    %c0_21 = arith.constant 0 : index
    %c0_22 = arith.constant 0 : index
    %34 = vector.load %arg10[%c0_21, %c0_22] : memref<1x32xf32, #tpu.memory_space<vmem>>, vector<1x32xf32>
    %cst_23 = arith.constant dense<0.000000e+00> : vector<1x8xf32>
    %35 = tpu.matmul %34, %33, %cst_23 {dimension_numbers = #tpu.dot_dimension_numbers<[1], [0], [0], [1], [0, 0, 1, 1], [], []>} : vector<1x32xf32>, vector<32x8xf32>, vector<1x8xf32> -> vector<1x8xf32>
    %c0_24 = arith.constant 0 : index
    %c0_25 = arith.constant 0 : index
    %36 = vector.load %arg11[%c0_24, %c0_25] : memref<1x1xf32, #tpu.memory_space<vmem>>, vector<1x1xf32>
    %37 = vector.broadcast %36 : vector<1x1xf32> to vector<1x8xf32>
    %38 = arith.addf %35, %37 : vector<1x8xf32>
    %c0_26 = arith.constant 0 : index
    %c0_27 = arith.constant 0 : index
    %c0_28 = arith.constant 0 : index
    %39 = vector.load %arg12[%c0_26, %c0_27, %c0_28] : memref<1x1x8xf32, #tpu.memory_space<vmem>>, vector<1x1x8xf32>
    %40 = vector.shape_cast %39 : vector<1x1x8xf32> to vector<1x8xf32>
    %41 = vector.shape_cast %38 : vector<1x8xf32> to vector<1x1x8xf32>
    tpu.vector_store %arg12[%c0_26, %c0_27, %c0_28], %41 {strides = array<i32>} : memref<1x1x8xf32, #tpu.memory_space<vmem>>, vector<1x1x8xf32>,
    return
  }
  func.func @transform_0(%arg0: i32, %arg1: i32) -> (i32, i32, i32) {
    %c0_i32 = arith.constant 0 : i32
    %c0_i32_0 = arith.constant 0 : i32
    %c0_i32_1 = arith.constant 0 : i32
    return %arg0, %c0_i32, %c0_i32_0 : i32, i32, i32
  }
  func.func @transform_1(%arg0: i32, %arg1: i32) -> (i32, i32, i32) {
    %c0_i32 = arith.constant 0 : i32
    %c0_i32_0 = arith.constant 0 : i32
    return %arg0, %c0_i32, %arg1 : i32, i32, i32
  }
  func.func @transform_2(%arg0: i32, %arg1: i32) -> (i32, i32) {
    %c0_i32 = arith.constant 0 : i32
    %c0_i32_0 = arith.constant 0 : i32
    %c0_i32_1 = arith.constant 0 : i32
    return %c0_i32, %c0_i32_0 : i32, i32
  }
  func.func @transform_3(%arg0: i32, %arg1: i32) -> (i32, i32) {
    %c0_i32 = arith.constant 0 : i32
    %c0_i32_0 = arith.constant 0 : i32
    %c0_i32_1 = arith.constant 0 : i32
    return %c0_i32, %c0_i32_0 : i32, i32
  }
  func.func @transform_4(%arg0: i32, %arg1: i32) -> (i32, i32) {
    %c0_i32 = arith.constant 0 : i32
    %c0_i32_0 = arith.constant 0 : i32
    %c0_i32_1 = arith.constant 0 : i32
    return %c0_i32, %c0_i32_0 : i32, i32
  }
  func.func @transform_5(%arg0: i32, %arg1: i32) -> (i32, i32) {
    %c0_i32 = arith.constant 0 : i32
    %c0_i32_0 = arith.constant 0 : i32
    %c0_i32_1 = arith.constant 0 : i32
    return %c0_i32, %c0_i32_0 : i32, i32
  }
  func.func @transform_6(%arg0: i32, %arg1: i32) -> (i32, i32) {
    %c0_i32 = arith.constant 0 : i32
    %c0_i32_0 = arith.constant 0 : i32
    %c0_i32_1 = arith.constant 0 : i32
    return %c0_i32, %c0_i32_0 : i32, i32
  }
  func.func @transform_7(%arg0: i32, %arg1: i32) -> (i32, i32) {
    %c0_i32 = arith.constant 0 : i32
    %c0_i32_0 = arith.constant 0 : i32
    %c0_i32_1 = arith.constant 0 : i32
    return %c0_i32, %c0_i32_0 : i32, i32
  }
  func.func @transform_8(%arg0: i32, %arg1: i32) -> (i32, i32) {
    %c0_i32 = arith.constant 0 : i32
    %c0_i32_0 = arith.constant 0 : i32
    %c0_i32_1 = arith.constant 0 : i32
    return %c0_i32, %c0_i32_0 : i32, i32
  }
  func.func @transform_9(%arg0: i32, %arg1: i32) -> (i32, i32) {
    %c0_i32 = arith.constant 0 : i32
    %c0_i32_0 = arith.constant 0 : i32
    %c0_i32_1 = arith.constant 0 : i32
    return %c0_i32, %c0_i32_0 : i32, i32
  }
  func.func @transform_10(%arg0: i32, %arg1: i32) -> (i32, i32, i32) {
    %c0_i32 = arith.constant 0 : i32
    %c0_i32_0 = arith.constant 0 : i32
    return %arg0, %c0_i32, %arg1 : i32, i32, i32
  }
}

</mosaic_0001>

<bundles_post_ra>
// kernel: local_activation_unit.1
= control target key start
LH: loop header
LB: loop body
LE: loop exit
PB: predicated region body
PF: predicated region fallthrough
CT: control target
= control target key end

     0   :  { %s1701_s0 = inlined_call_operand.vmem [shape: f32[2,1,4], index: 0, kind: input, shape index: {}]   ;;  %s1702_s1 = inlined_call_operand.vmem [shape: f32[2,4,8], index: 1, kind: input, shape index: {}]   ;;  %s1703_s2 = inlined_call_operand.vmem [shape: f32[64,4], index: 2, kind: input, shape index: {}]   ;;  %s1704_s3 = inlined_call_operand.vmem [shape: f32[64,4], index: 3, kind: input, shape index: {}]   ;;  %s1705_s4 = inlined_call_operand.vmem [shape: f32[64,4], index: 4, kind: input, shape index: {}]   ;;  %s1706_s5 = inlined_call_operand.vmem [shape: f32[64,1], index: 5, kind: input, shape index: {}]   ;;  %s1707_s6 = inlined_call_operand.vmem [shape: f32[32,64], index: 6, kind: input, shape index: {}]   ;;  %s1708_s7 = inlined_call_operand.vmem [shape: f32[32,1], index: 7, kind: input, shape index: {}]   ;;  %s1709_s8 = inlined_call_operand.vmem [shape: f32[1,32], index: 8, kind: input, shape index: {}]   ;;  %s1710_s9 = inlined_call_operand.<no memory space> [shape: f32[1,1], index: 9, kind: input, shape index: {}]   ;;  %s1711_s10 = inlined_call_operand.hbm [shape: f32[2,1,8], index: 10, kind: output, shape index: {}]  }
   0x1   :  { %v15_v0 = vstv %s1710_s9 }
   0x2   :  { %16 = vst [vmem:[#allocation2] sm:$0x1] %v15_v0 }
   0x3   :  { %17 = vsyncpa [#allocation4], 0 }
   0x4   :  { %19 = vsyncpa [#allocation4 + $0x1], 0  ;;  %s1423_s15 = smov 0   ;;  %s1425_s16 = smov 0  }
   0x5   :  { %s1427_s17 = smov 0   ;;  %s1429_s18 = smov 0  }
   0x6   :  { %s1431_s19 = smov 0   ;;  %s1433_s20 = smov 0  }
   0x7 LB: > { %1714 = sst [smem:[#allocation6_spill]] %s1354_s19  ;;  %s1040_s9 = sadd.s32 4294967295, %s1358_s20   ;;  %s1358_s20 = sphi %s1433_s20, %s25_s20   ;;  %s1354_s19 = sphi %s1431_s19, %s1719_s19   ;;  %s1350_s18 = sphi %s1429_s18, %s1718_s18   ;;  %s1346_s17 = sphi %s1427_s17, %s1722_s17   ;;  %s1342_s16 = sphi %s1425_s16, %s1721_s16   ;;  %s1338_s15 = sphi %s1423_s15, %s1720_s15  }
   0x8   : > { %s1041_s21 = sadd.s32 4294967294, %s1358_s20   ;;  %s37_s22 = sadd.s32 1, %s1354_s19 }
   0x9   : > { %s268_s23 = sadd.s32 1, %s1346_s17  ;;  %p39_p0 = scmp.ge.s32.totalorder %s37_s22, 2 }
   0xa   : > { %p278_p1 = scmp.ne.s32.totalorder %s1346_s17, %s1342_s16  ;;  %p279_p2 = scmp.eq.s32.totalorder %s1040_s9, 1 }
   0xb   : > { %p284_p3 = scmp.ne.s32.totalorder %s1342_s16, %s1338_s15  ;;  %s1724_s22 = smov (%p39_p0, %s37_s22), 0 }
   0xc   : > { %1715 = sst [smem:[#allocation7_spill]] %s1724_s22  ;;  %p1463_p4 = por %p279_p2, %p278_p1 }
   0xd   : > { %p285_p5 = scmp.eq.s32.totalorder %s1041_s21, 1  ;;  %s263_s25 = ssub.s32 %s1354_s19, %s1724_s22 }
   0xe   : > { %p1044_p6 = scmp.ge.s32.totalorder %s1358_s20, 1  ;;  %p266_p7 = scmp.eq.s32.totalorder %s263_s25, 0 }
   0xf   : > { %p1470_p8 = por %p285_p5, %p284_p3  ;;  %p343_p9 = scmp.lt.s32.totalorder %s1358_s20, 3 }
  0x10   : > { %s1476_s27 = scalar_select %p266_p7, %s1346_s17, %s268_s23  }
  0x11   : > { %p344_p10 = pnand %p1044_p6, %p343_p9 }
  0x12   : > { %p385_p11 = scmp.lt.s32.totalorder (!%p344_p10), %s1350_s18, 1  ;;  %v442_v1 = vld [vmem:[%s1703_s2] sm:$0xff] (!%p344_p10)  ;;  %v443_v2 = vld [vmem:[%s1703_s2 + $0x8] sm:$0xff] (!%p344_p10)  ;;  %v444_v3 = vld [vmem:[%s1703_s2 + $0x10] sm:$0xff] (!%p344_p10)  ;;  %vm556_vm0 = vcmask (!%p344_p10), 1043456   ;;  %vm458_vm1 = vcmask (!%p344_p10), 31744  }
  0x13   : > { %347 = sbr.rel (%p344_p10) target bundleno = 845 (0x34d), region = 60  ;;  %v445_v4 = vld [vmem:[%s1703_s2 + $0x18] sm:$0xff] (!%p344_p10)  ;;  %v446_v10 = vld [vmem:[%s1703_s2 + $0x20] sm:$0xff] (!%p344_p10)  ;;  %v447_v11 = vld [vmem:[%s1703_s2 + $0x28] sm:$0xff] (!%p344_p10)  ;;  %v1360_v59 = vmov (!%p344_p10), 0   ;;  %vm741_vm2 = vcmask (!%p344_p10), 523264  }
  0x14   : > { %v404_v13 = vld [vmem:[%s1705_s4] sm:$0xff] (!%p344_p10)  ;;  %v405_v14 = vld [vmem:[%s1705_s4 + $0x8] sm:$0xff] (!%p344_p10)  ;;  %v406_v15 = vld [vmem:[%s1705_s4 + $0x10] sm:$0xff] (!%p344_p10)  ;;  %1230 = vset.pattern.permute.xlu0 (!%p344_p10), %v1360_v59  ;;  %1231 = vset.pattern.permute.xlu1 (!%p344_p10), %v1360_v59  ;;  %vm1362_vm3 = vmmov (!%p344_p10), 0   ;;  %vm874_vm4 = vcmask (!%p344_p10), 261120   ;;  %s383_s25 = sand.u32 (!%p344_p10), 1, %s1342_s16  }
  0x15   : > { %v396_v18 = vld [vmem:[%s1704_s3] sm:$0xff] (!%p344_p10)  ;;  %v407_v19 = vld [vmem:[%s1705_s4 + $0x18] sm:$0xff] (!%p344_p10)  ;;  %v397_v23 = vld [vmem:[%s1704_s3 + $0x8] sm:$0xff] (!%p344_p10)  ;;  %s1073_s29 = sshll.u32 (!%p344_p10), %s1350_s18, 4  ;;  %s384_s30 = scalar_lea.vmem (!%p344_p10), [#allocation3], %s383_s25  ;;  %vm948_vm5 = vcmask (!%p344_p10), 57344  }
  0x16   : > { %v398_v24 = vld [vmem:[%s1704_s3 + $0x10] sm:$0xff] (!%p344_p10)  ;;  %v408_v25 = vld [vmem:[%s1705_s4 + $0x20] sm:$0xff] (!%p344_p10)  ;;  %v449_v31 = vld [vmem:[%s1703_s2 + $0x38] sm:$0xff] (!%p344_p10) }
  0x17   : > { %v448_v30 = vld [vmem:[%s1703_s2 + $0x30] sm:$0xff] (!%p344_p10)  ;;  %v399_v36 = vld [vmem:[%s1704_s3 + $0x18] sm:$0xff] (!%p344_p10)  ;;  %v409_v38 = vld [vmem:[%s1705_s4 + $0x28] sm:$0xff] (!%p344_p10) }
  0x18   : > { %v400_v39 = vld [vmem:[%s1704_s3 + $0x20] sm:$0xff] (!%p344_p10)  ;;  %v410_v40 = vld [vmem:[%s1705_s4 + $0x30] sm:$0xff] (!%p344_p10)  ;;  %v401_v48 = vld [vmem:[%s1704_s3 + $0x28] sm:$0xff] (!%p344_p10) }
  0x19   : > { %v411_v50 = vld [vmem:[%s1705_s4 + $0x38] sm:$0xff] (!%p344_p10)  ;;  %v402_v51 = vld [vmem:[%s1704_s3 + $0x30] sm:$0xff] (!%p344_p10)  ;;  %v434_v60 = vld [vmem:[%s1706_s5] sm:$0xff] (!%p344_p10) }
  0x1a   : > { %s386_s28 = scalar_select %p385_p11, %s1350_s18, 1  ;;  %v403_v57 = vld [vmem:[%s1704_s3 + $0x38] sm:$0xff]  ;;  %v435_v63 = vld [vmem:[%s1706_s5 + $0x8] sm:$0xff] }
  0x1c   : > { %s387_s22 = scalar_lea.vmem %s1701_s0, %s386_s28  ;;  %s1045_s19 = sshll.u32 %s386_s28, 2 }
  0x1d   : > { %v1495_v5 = vld [vmem:[%s387_s22] ss:$0 sm:$0xff]  ;;  %s394_s11 = scalar_lea.vmem %s1702_s1, %s1045_s19  ;;  %s1654_s28 = scalar_lea.hbm %s1711_s10, %s1073_s29 }
  0x1e   : > { %v450_v6 = vmul.f32 %v1495_v5, %v442_v1  ;;  %v451_v7 = vmul.f32 %v1495_v5, %v443_v2  ;;  %v452_v8 = vmul.f32 %v1495_v5, %v444_v3  ;;  %v453_v9 = vmul.f32 %v1495_v5, %v445_v4  ;;  %v491_v12 = vld [vmem:[%s394_s11] sm:$0xf]  ;;  %v436_v2 = vld [vmem:[%s1706_s5 + $0x10] sm:$0xff]  ;;  %v718_v3 = vld [vmem:[%s1708_s7 + $0x8] sm:$0xff]  ;;  %s964_s11 = sshll.u32 %s384_s30, 4  ;;  %s951_s22 = scalar_lea.sflag [#allocation4], %s383_s25  ;;  %s1656_s11 = int_to_ptr.vmem [resolvable:$true] %s964_s11 }
  0x1f   : > { %1102 = vmatprep.subr.msk.mxu0 %vm556_vm0, %v491_v12  ;;  %v454_v21 = vmul.f32 %v1495_v5, %v446_v10  ;;  %v455_v22 = vmul.f32 %v1495_v5, %v447_v11  ;;  %v418_v27 = vmul.f32 %v1495_v5, %v404_v13  ;;  %v419_v28 = vmul.f32 %v1495_v5, %v405_v14  ;;  %v438_v10 = vld [vmem:[%s1706_s5 + $0x20] sm:$0xff]  ;;  %v439_v13 = vld [vmem:[%s1706_s5 + $0x28] sm:$0xff]  ;;  %s1280_s18 = scalar_lea.vmem %s1656_s11, 16  ;;  %s1364_s19 = smov [#allocation3]  }
  0x20   : > { %v459_v16 = vsel %vm458_vm1, %v450_v6, 0.0  ;;  %v465_v17 = vsel %vm458_vm1, %v452_v8, 0.0  ;;  %1103 = vmatpush3.msk.msra.mxu0 %vm556_vm0, %v491_v12  ;;  %v462_v20 = vsel %vm458_vm1, %v451_v7, 0.0  ;;  %v468_v26 = vsel %vm458_vm1, %v453_v9, 0.0  ;;  %v437_v6 = vld [vmem:[%s1706_s5 + $0x18] sm:$0xff]  ;;  %p1281_p12 = scmp.ne.s32.totalorder %s1656_s11, %s1280_s18  ;;  %s1284_s14 = sshll.u32 %s1364_s19, 4  ;;  %s1285_s14 = int_to_ptr.vmem [resolvable:$false] %s1284_s14 }
  0x21   : > { %460 = vadd.xlane.f32.xlu0 %v459_v16  ;;  %466 = vadd.xlane.f32.xlu1 %v465_v17  ;;  %v420_v29 = vmul.f32 %v1495_v5, %v406_v15  ;;  %v421_v32 = vmul.f32 %v1495_v5, %v407_v19  ;;  %v426_v33 = vadd.f32 %v418_v27, %v396_v18  ;;  %v471_v41 = vsel %vm458_vm1, %v454_v21, 0.0  ;;  %v720_v8 = vld [vmem:[%s1708_s7 + $0x18] sm:$0xff]  ;;  %v440_v16 = vld [vmem:[%s1706_s5 + $0x30] sm:$0xff]  ;;  %s1286_s9 = scalar_lea.vmem %s1285_s14, 32  ;;  %p1287_p1 = scmp.lt.s32.totalorder %s1656_s11, %s1285_s14 }
  0x22   : > { %v427_v34 = vadd.f32 %v419_v28, %v397_v23  ;;  %v422_v37 = vmul.f32 %v1495_v5, %v408_v25  ;;  %v474_v42 = vsel %vm458_vm1, %v455_v22, 0.0  ;;  %v456_v43 = vmul.f32 %v1495_v5, %v448_v30  ;;  %v441_v19 = vld [vmem:[%s1706_s5 + $0x38] sm:$0xff]  ;;  %v717_v22 = vld [vmem:[%s1708_s7] sm:$0xff]  ;;  %v719_v23 = vld [vmem:[%s1708_s7 + $0x10] sm:$0xff]  ;;  %p1282_p13 = pnand %p1281_p12, %p1463_p4  ;;  %p1288_p2 = scmp.lt.s32.totalorder %s1286_s9, %s1280_s18 }
  0x23   : > { %v428_v35 = vadd.f32 %v420_v29, %v398_v24  ;;  %v457_v44 = vmul.f32 %v1495_v5, %v449_v31  ;;  %1104 = vmatprep.mubr.msk.f32.mxu0 %vm458_vm1, %v426_v33  ;;  %v429_v45 = vadd.f32 %v421_v32, %v399_v36  ;;  %v423_v46 = vmul.f32 %v1495_v5, %v409_v38  ;;  %v864_v24 = vld [vmem:[#allocation2] sm:$0x1] }
  0x24   : > { %1105 = vmatmul.mubr.msk.f32.vlgmr.msra.gmra.mrb[0].mxu0 %vm458_vm1, %v427_v34  ;;  %v430_v47 = vadd.f32 %v422_v37, %v400_v39  ;;  %v424_v49 = vmul.f32 %v1495_v5, %v410_v40  ;;  %v477_v52 = vsel %vm458_vm1, %v456_v43, 0.0  ;;  %v425_v55 = vmul.f32 %v1495_v5, %v411_v50  ;;  %v713_v25 = vld [vmem:[%s1707_s6] sm:$0xff]  ;;  %p1283_p0 = pneg %p1282_p13  ;;  %p1289_p3 = por %p1288_p2, %p1287_p1 }
  0x25   : > { %463 = vadd.xlane.f32.xlu0 %v462_v20  ;;  %469 = vadd.xlane.f32.xlu1 %v468_v26  ;;  %v480_v53 = vsel %vm458_vm1, %v457_v44, 0.0  ;;  %v431_v54 = vadd.f32 %v423_v46, %v401_v48 }
  0x26   : > { %1107 = vmatprep.mubr.msk.f32.mxu0 %vm458_vm1, %v428_v35  ;;  %v432_v56 = vadd.f32 %v424_v49, %v402_v51  ;;  %v433_v58 = vadd.f32 %v425_v55, %v403_v57  ;;  %1132 = vmatprep.mubr.msk.f32.mxu1 %vm741_vm2, %v713_v25  ;;  %v1361_v25 = vmov 0.0|0.0   ;;  %p1290_p5 = pnand %p1289_p3, %p1283_p0 }
  0x27   : > { %1165 = vmatprep.subr.bf16.mxu0 %v1361_v25 }
  0x28   : > { %1108 = vmatmul.mubr.msk.f32.gmra.mrb[2].mxu0 %vm458_vm1, %v429_v45 }
  0x29   : > { %472 = vadd.xlane.f32.xlu0 %v471_v41  ;;  %475 = vadd.xlane.f32.xlu1 %v474_v42 }
  0x2a   : > { %1110 = vmatprep.mubr.msk.f32.mxu0 %vm458_vm1, %v430_v47 }
  0x2c   : > { %1111 = vmatmul.mubr.msk.f32.gmra.mrb[4].mxu0 %vm458_vm1, %v431_v54 }
  0x2d   : > { %478 = vadd.xlane.f32.xlu0 %v477_v52  ;;  %481 = vadd.xlane.f32.xlu1 %v480_v53 }
  0x2e   : > { %1113 = vmatprep.mubr.msk.f32.mxu0 %vm458_vm1, %v432_v56 }
  0x30   : > { %1114 = vmatmul.mubr.msk.f32.gmra.mrb[6].mxu0 %vm458_vm1, %v433_v58 }
  0xae   : > { %v461_v61 = vpop.xlane.xlu0 %460  ;;  %v467_v0 = vpop.xlane.xlu1 %466 }
  0xaf   : > { %v483_v62 = vadd.f32 %v461_v61, %v434_v60  ;;  %v485_v5 = vadd.f32 %v467_v0, %v436_v2 }
  0xb1   : > { %494 = vperm.xlu0 %1230, %v483_v62  }
  0xb2   : > { %v464_v1 = vpop.xlane.xlu0 %463  ;;  %v470_v7 = vpop.xlane.xlu1 %469 }
  0xb3   : > { %v484_v4 = vadd.f32 %v464_v1, %v435_v63  ;;  %v486_v9 = vadd.f32 %v470_v7, %v437_v6 }
  0xb5   : > { %499 = vperm.xlu1 %1231, %v484_v4   ;;  %728 = vperm.xlu0 %1230, %v718_v3  }
  0xb6   : > { %v473_v11 = vpop.xlane.xlu0 %472  ;;  %v476_v14 = vpop.xlane.xlu1 %475 }
  0xb7   : > { %v487_v12 = vadd.f32 %v473_v11, %v438_v10  ;;  %v488_v15 = vadd.f32 %v476_v14, %v439_v13 }
  0xb9   : > { %504 = vperm.xlu1 %1231, %v485_v5   ;;  %738 = vperm.xlu0 %1230, %v720_v8  }
  0xba   : > { %v479_v17 = vpop.xlane.xlu0 %478  ;;  %v482_v20 = vpop.xlane.xlu1 %481 }
  0xbb   : > { %v489_v18 = vadd.f32 %v479_v17, %v440_v16  ;;  %v490_v21 = vadd.f32 %v482_v20, %v441_v19 }
  0xbd   : > { %509 = vperm.xlu1 %1231, %v486_v9  }
  0xc1   : > { %514 = vperm.xlu1 %1231, %v487_v12  }
  0xc5   : > { %519 = vperm.xlu1 %1231, %v488_v15  }
  0xc9   : > { %524 = vperm.xlu1 %1231, %v489_v18  }
  0xcd   : > { %529 = vperm.xlu1 %1231, %v490_v21  }
  0xd1   : > { %723 = vperm.xlu1 %1231, %v717_v22   ;;  %v714_v22 = vld [vmem:[%s1707_s6 + $0x8] sm:$0xff] }
  0xd5   : > { %733 = vperm.xlu1 %1231, %v719_v23   ;;  %v715_v23 = vld [vmem:[%s1707_s6 + $0x10] sm:$0xff] }
  0xd9   : > { %867 = vperm.xlu1 %1231, %v864_v24   ;;  %v716_v24 = vld [vmem:[%s1707_s6 + $0x18] sm:$0xff] }
  0xf7   : > { %v1106_v26 = vpop.f32.mrb[0].mxu0 }
  0xf8   : > { %v626_v27 = vpop.f32.mrb[1].mxu0 }
  0xfb   : > { %v1109_v28 = vpop.f32.mrb[2].mxu0 }
  0xfc   : > { %v636_v29 = vpop.f32.mrb[3].mxu0 }
  0xff   : > { %v1112_v30 = vpop.f32.mrb[4].mxu0 }
 0x100   : > { %v646_v31 = vpop.f32.mrb[5].mxu0 }
 0x103   : > { %v1115_v32 = vpop.f32.mrb[6].mxu0 }
 0x104   : > { %v656_v33 = vpop.f32.mrb[7].mxu0 }
 0x130   : > { %v495_v34 = vpop.permute.xlu0 %494 }
 0x131   : > { %v627_v35 = vadd.f32 %v626_v27, %v495_v34 }
 0x133   : > { %v1056_v36 = vmul.f32 -1.442695, %v627_v35 }
 0x134   : > { %v500_v37 = vpop.permute.xlu1 %499  ;;  %v729_v27 = vpop.permute.xlu0 %728 }
 0x135   : > { %1232 = vpow2.f32 %v1056_v36  ;;  %v632_v38 = vadd.f32 %v1106_v26, %v500_v37  ;;  %v1363_v26 = vmov 0.0  }
 0x136   : > { %1146 = vmatprep.mubr.msk.f32.mxu0 %vm1362_vm3, %v1363_v26 }
 0x137   : > { %v1057_v39 = vmul.f32 -1.442695, %v632_v38 }
 0x138   : > { %v505_v40 = vpop.permute.xlu1 %504  ;;  %v739_v34 = vpop.permute.xlu0 %738 }
 0x139   : > { %1234 = vpow2.f32 %v1057_v39  ;;  %v637_v41 = vadd.f32 %v636_v29, %v505_v40 }
 0x13b   : > { %v1058_v42 = vmul.f32 -1.442695, %v637_v41 }
 0x13c   : > { %v510_v43 = vpop.permute.xlu1 %509 }
 0x13d   : > { %1236 = vpow2.f32 %v1058_v42  ;;  %v642_v44 = vadd.f32 %v1109_v28, %v510_v43 }
 0x13f   : > { %v1233_v45 = vpop.eup %1232  ;;  %v1059_v46 = vmul.f32 -1.442695, %v642_v44 }
 0x140   : > { %v689_v47 = vadd.f32 1.0, %v1233_v45  ;;  %v515_v48 = vpop.permute.xlu1 %514 }
 0x141   : > { %1238 = vpow2.f32 %v1059_v46  ;;  %v647_v49 = vadd.f32 %v646_v31, %v515_v48 }
 0x142   : > { %1240 = vrcp.f32 %v689_v47 }
 0x143   : > { %v1235_v50 = vpop.eup %1234  ;;  %v1060_v51 = vmul.f32 -1.442695, %v647_v49 }
 0x144   : > { %v690_v52 = vadd.f32 1.0, %v1235_v50  ;;  %v520_v53 = vpop.permute.xlu1 %519 }
 0x145   : > { %1242 = vpow2.f32 %v1060_v51  ;;  %v652_v54 = vadd.f32 %v1112_v30, %v520_v53 }
 0x146   : > { %1244 = vrcp.f32 %v690_v52 }
 0x147   : > { %v1237_v55 = vpop.eup %1236  ;;  %v1061_v56 = vmul.f32 -1.442695, %v652_v54 }
 0x148   : > { %v691_v57 = vadd.f32 1.0, %v1237_v55  ;;  %v525_v58 = vpop.permute.xlu1 %524 }
 0x149   : > { %1246 = vpow2.f32 %v1061_v56  ;;  %v657_v59 = vadd.f32 %v656_v33, %v525_v58  ;;  %v870_v58 = vlaneseq }
 0x14a   : > { %1248 = vrcp.f32 %v691_v57  ;;  %v863_v57 = vld [vmem:[%s1709_s8] sm:$0x1] }
 0x14b   : > { %v1239_v60 = vpop.eup %1238  ;;  %v1062_v61 = vmul.f32 -1.442695, %v657_v59  ;;  %v871_v59 = vshrl.u32 %v870_v58, 7 }
 0x14c   : > { %v692_v62 = vadd.f32 1.0, %v1239_v60  ;;  %v530_v63 = vpop.permute.xlu1 %529  ;;  %v1241_v1 = vpop.eup %1240 }
 0x14d   : > { %1250 = vpow2.f32 %v1062_v61  ;;  %v662_v0 = vadd.f32 %v1115_v32, %v530_v63  ;;  %v872_v60 = vsub.s32 0, %v871_v59 }
 0x14e   : > { %1252 = vrcp.f32 %v692_v62 }
 0x14f   : > { %v1243_v2 = vpop.eup %1242  ;;  %v1063_v3 = vmul.f32 -1.442695, %v662_v0 }
 0x150   : > { %v1245_v4 = vpop.eup %1244  ;;  %v693_v5 = vadd.f32 1.0, %v1243_v2  ;;  %v724_v28 = vpop.permute.xlu1 %723 }
 0x151   : > { %1254 = vpow2.f32 %v1063_v3  ;;  %v1149_v6 = vpack.c.bf16 %v1245_v4, %v1241_v1 }
 0x152   : > { %1256 = vrcp.f32 %v693_v5 }
 0x153   : > { %v1247_v7 = vpop.eup %1246  ;;  %1150 = vmatprep.subr.bf16.mxu1 %v1149_v6 }
 0x154   : > { %v694_v8 = vadd.f32 1.0, %v1247_v7  ;;  %1152 = vmatpush3.bf16.msra.mxu1 %v1149_v6  ;;  %v1249_v9 = vpop.eup %1248  ;;  %v734_v37 = vpop.permute.xlu1 %733 }
 0x156   : > { %1258 = vrcp.f32 %v694_v8 }
 0x157   : > { %v1251_v10 = vpop.eup %1250 }
 0x158   : > { %v1253_v11 = vpop.eup %1252  ;;  %v695_v12 = vadd.f32 1.0, %v1251_v10  ;;  %v868_v61 = vpop.permute.xlu1 %867 }
 0x159   : > { %v1153_v13 = vpack.c.bf16 %v1253_v11, %v1249_v9  ;;  %v873_v62 = vrot.slane %v868_v61, %v872_v60 }
 0x15a   : > { %1260 = vrcp.f32 %v695_v12 }
 0x15b   : > { %v1255_v14 = vpop.eup %1254  ;;  %1154 = vmatprep.subr.bf16.mxu1 %v1153_v13 }
 0x15c   : > { %v696_v15 = vadd.f32 1.0, %v1255_v14  ;;  %1156 = vmatpush3.bf16.msra.mxu1 %v1153_v13  ;;  %v1257_v16 = vpop.eup %1256 }
 0x15e   : > { %1262 = vrcp.f32 %v696_v15 }
 0x160   : > { %v1259_v17 = vpop.eup %1258 }
 0x161   : > { %v1157_v18 = vpack.c.bf16 %v1259_v17, %v1257_v16 }
 0x163   : > { %1158 = vmatprep.subr.bf16.mxu1 %v1157_v18 }
 0x164   : > { %1160 = vmatpush3.bf16.msra.mxu1 %v1157_v18  ;;  %v1261_v19 = vpop.eup %1260 }
 0x168   : > { %v1263_v20 = vpop.eup %1262 }
 0x169   : > { %v1161_v21 = vpack.c.bf16 %v1263_v20, %v1261_v19 }
 0x16b   : > { %1162 = vmatprep.subr.bf16.mxu1 %v1161_v21 }
 0x16c   : > { %1164 = vmatpush3.bf16.msra.mxu1 %v1161_v21 }
 0x16f   : > { %1133 = vmatmul.mubr.msk.f32.vlgmr.msra.gmra.mrb[0].mxu1 %vm741_vm2, %v714_v22 }
 0x170   : > { %1135 = vmatprep.mubr.msk.f32.mxu1 %vm741_vm2, %v715_v23 }
 0x173   : > { %1136 = vmatmul.mubr.msk.f32.gmra.mrb[2].mxu1 %vm741_vm2, %v716_v24 }
 0x242   : > { %v1134_v29 = vpop.f32.mrb[0].mxu1 }
 0x243   : > { %v826_v30 = vadd.f32 %v1134_v29, %v729_v27  ;;  %v820_v31 = vpop.f32.mrb[1].mxu1 }
 0x244   : > { %v821_v32 = vadd.f32 %v820_v31, %v724_v28 }
 0x245   : > { %v1069_v33 = vmul.f32 -1.442695, %v826_v30 }
 0x246   : > { %v1068_v35 = vmul.f32 -1.442695, %v821_v32  ;;  %v1137_v36 = vpop.f32.mrb[2].mxu1 }
 0x247   : > { %1264 = vpow2.f32 %v1069_v33  ;;  %v836_v38 = vadd.f32 %v1137_v36, %v739_v34  ;;  %v830_v39 = vpop.f32.mrb[3].mxu1 }
 0x248   : > { %1266 = vpow2.f32 %v1068_v35  ;;  %v831_v40 = vadd.f32 %v830_v39, %v734_v37 }
 0x249   : > { %v1071_v41 = vmul.f32 -1.442695, %v836_v38 }
 0x24a   : > { %v1070_v42 = vmul.f32 -1.442695, %v831_v40 }
 0x24b   : > { %1268 = vpow2.f32 %v1071_v41 }
 0x24c   : > { %1270 = vpow2.f32 %v1070_v42 }
 0x251   : > { %v1265_v43 = vpop.eup %1264 }
 0x252   : > { %v1267_v44 = vpop.eup %1266  ;;  %v852_v45 = vadd.f32 1.0, %v1265_v43 }
 0x253   : > { %v851_v46 = vadd.f32 1.0, %v1267_v44 }
 0x254   : > { %1272 = vrcp.f32 %v852_v45 }
 0x255   : > { %v1269_v47 = vpop.eup %1268  ;;  %1274 = vrcp.f32 %v851_v46 }
 0x256   : > { %v1271_v48 = vpop.eup %1270  ;;  %v854_v49 = vadd.f32 1.0, %v1269_v47 }
 0x257   : > { %v853_v50 = vadd.f32 1.0, %v1271_v48 }
 0x258   : > { %1276 = vrcp.f32 %v854_v49 }
 0x259   : > { %1278 = vrcp.f32 %v853_v50 }
 0x25e   : > { %v1273_v51 = vpop.eup %1272 }
 0x25f   : > { %v1275_v52 = vpop.eup %1274 }
 0x260   : > { %v1166_v53 = vpack.c.bf16 %v1273_v51, %v1275_v52 }
 0x262   : > { %v1277_v54 = vpop.eup %1276  ;;  %1167 = vmatpush3.bf16.msra.mxu0 %v1166_v53 }
 0x263   : > { %v1279_v55 = vpop.eup %1278  ;;  %1168 = vmatprep.subr.bf16.mxu0 %v1361_v25 }
 0x264   : > { %v1169_v56 = vpack.c.bf16 %v1277_v54, %v1279_v55 }
 0x266   : > { %1170 = vmatpush3.bf16.msra.mxu0 %v1169_v56 }
 0x269   : > { %1147 = vmatmul.mubr.msk.f32.vlgmr.msra.gmra.mrb[8].mxu0 %vm874_vm4, %v863_v57 }
 0x33c   : > { %v944_v63 = vpop.f32.mrb[8].mxu0 }
 0x33d   : > { %v945_v0 = vadd.f32 %v944_v63, %v873_v62  ;;  %v1148_v1 = vpop.f32.mrb[9].mxu0 }
 0x33f   : > { %949 = vst.msk [vmem:[%s384_s30] sm:$0x1] %vm948_vm5, %v945_v0 }
 0x340   : > { %1293 = shalt.err (!%p1290_p5)
}
 0x341   : > { %s1294_s21 = scalar_lea.hbm %s1654_s28, 16  ;;  %s1298_s29 = scalar_lea.hbm %s1711_s10, 32 }
 0x342   : > { %p1295_p6 = scmp.ne.s32.totalorder %s1654_s28, %s1294_s21  ;;  %p1299_p10 = scmp.lt.u32.totalorder %s1654_s28, %s1711_s10 }
 0x343   : > { %p1300_p11 = scmp.lt.u32.totalorder %s1298_s29, %s1294_s21  ;;  %p1302_p13 = scmp.lt.u32.totalorder %s1294_s21, %s1654_s28 }
 0x344   : > { %p1296_p7 = pnand %p1295_p6, %p1463_p4 }
 0x345   : > { %p1301_p12 = por %p1300_p11, %p1299_p10 }
 0x346   : > { %p1297_p9 = pneg %p1296_p7 }
 0x347   : > { %p1303_p0 = por %p1302_p13, %p1301_p12 }
 0x349   : > { %p1304_p1 = pnand %p1303_p0, %p1297_p9 }
 0x34b   : > { %1307 = shalt.err (!%p1304_p1)
}
 0x34c   : > { %1171 = dma.vmem_to_hbm [thread:$0]  (%p1463_p4), %s1656_s11, 16, %s1654_s28, %s951_s22  }
 0x34d PF: > { %p1177_p2 = scmp.ge.s32.totalorder %s1358_s20, 2  ;;  %s976_s13 = sand.u32 1, %s1338_s15  }
 0x34e   : > { %s977_s18 = scalar_lea.sflag [#allocation4], %s976_s13 }
 0x34f   : > { %p1174_p3 = pnand %p1177_p2, %p1470_p8 }
 0x351   : > { %1333 = dma.done.wait (!%p1174_p3), %s977_s18, 16  }
 0x352   : > { %1335 = vsyncadd (!%p1174_p3), %s977_s18, 4294967280  ;;  %s25_s20 = sadd.s32 1, %s1358_s20   ;;  %s1718_s18 = sld [smem:[#allocation6_spill]] }
 0x353   : > { %p22_p5 = scmp.ge.s32.totalorder %s25_s20, 4   ;;  %s1719_s19 = sld [smem:[#allocation7_spill]] }
 0x354   : > { %s1720_s15 = smov %s1342_s16  ;;  %s1721_s16 = smov %s1346_s17 }
 0x355   : > { %s1722_s17 = smov %s1476_s27  ;;  %24 = sbr.rel (!%p22_p5) target bundleno = 7 (0x7), region = 98 }
 0x35c   :  { %981 = vsyncpa [#allocation4], 1 }
 0x35d   :  { %983 = vsyncpa [#allocation4 + $0x1], 1 }

</bundles_post_ra>
